<compile_context>
chip_gen: v7x
topology: tpu7x:2x2x1
jax: 0.10.0
libtpu: 0.0.40
codegen_flags: <defaults>
</compile_context>

<pallas_src>
import jax
import jax.numpy as jnp
import numpy as np
from jax.experimental import pallas as pl
from jax.experimental.pallas import tpu as pltpu

KERNEL_SIZE = 11
KERNEL_SIGMA = 1.5
K1 = 0.01
K2 = 0.03


# ----------------------------------------------------------------------------
# Host-side constants
# ----------------------------------------------------------------------------
def _gaussian_1d_np(kernel_size, sigma):
    coords = np.arange(kernel_size, dtype=np.float64) - (kernel_size - 1) / 2.0
    g = np.exp(-(coords ** 2) / (2.0 * sigma ** 2))
    return (g / g.sum()).astype(np.float32)


def _row_band_matrix_np(ho, hp, h, g):
    """(hp, h) band matrix: rows < ho hold the 1D Gaussian of a 'valid' row
    correlation; rows >= ho are zero padding (sublane alignment, masked)."""
    m = np.zeros((hp, h), dtype=np.float32)
    k = g.shape[0]
    for i in range(ho):
        m[i, i:i + k] = g
    return m


def _tpu_budget():
    """(physical VMEM bytes, TensorCore count) with conservative fallbacks."""
    vmem_bytes = 64 * 1024 * 1024          # v7x floor: safe on every generation
    n_cores = 1
    try:
        info = pltpu.get_tpu_info()
        vmem_bytes = int(getattr(info, "vmem_capacity_bytes", vmem_bytes))
        for name in ("num_cores", "core_count", "tensorcore_count"):
            val = getattr(info, name, None)
            if val:
                n_cores = max(1, int(val))
                break
    except Exception:                       # query unavailable: keep the floor
        pass
    try:
        n_cores = max(n_cores, int(getattr(jax.devices()[0], "num_cores", 1) or 1))
    except Exception:
        pass
    return vmem_bytes, n_cores


def _choose_chunk(nc, h, w, vmem_bytes, n_cores):
    """Pick images-per-block `chunk`; returns (chunk, G = ceil(nc / chunk)).

    Priorities (per review): lane-dense blocks (chunk*W a multiple of 128, up
    to ~4 vregs, which also fills v6e/v7x's 256-wide MXUs), grid shardable
    across TensorCores (v7x) as long as blocks keep >= 128 lanes, no dummy
    padding when a clean divisor exists, per-generation VMEM budget (block
    working set ~28 * H * chunk*W floats kept under ~1/4 of physical VMEM).
    Awkward nc is padded up to a multiple of chunk (dummy images masked in
    the kernel) instead of collapsing to chunk = 1.
    """
    per_image_bytes = 28 * h * w * 4                   # inputs x 2 bufs + temps
    vmem_cap = max(1, (vmem_bytes // 4) // per_image_bytes)
    lane_cap = max(1, 1024 // max(w, 1))               # <= ~8 vregs of lanes
    min_dense = -(-128 // max(w, 1))                   # images for >=128 lanes
    cap = max(1, min(vmem_cap, lane_cap, max(nc, min_dense)))

    best_key, chunk = None, 1
    for c in range(1, cap + 1):
        g = -(-nc // c)
        lanes = c * w
        key = (
            lanes % 128 == 0,                  # vreg-dense lane axis
            lanes >= 128,                      # at least one full vreg wide
            n_cores == 1 or g % n_cores == 0,  # grid shardable across TCs (v7x)
            g * c == nc,                       # no dummy-image padding needed
            min(lanes, 512),                   # wider (up to ~4 vregs), then...
            -g,                                # ...fewer grid steps
        )
        if best_key is None or key > best_key:
            best_key, chunk = key, c
    return chunk, -(-nc // chunk)


# ----------------------------------------------------------------------------
# Kernel
# ----------------------------------------------------------------------------
def _build_kernel(*, H, W, Ho, Wo, Hp, CW, chunk, G, last_valid, gauss):
    K = KERNEL_SIZE
    CWv = CW - (K - 1)                  # valid-ish column width per stat group
    width = 5 * CW - (K - 1)
    need_image_mask = last_valid != chunk   # only when N*C was padded

    def kernel(x_ref, y_ref, a_ref, ssim_ref, l1_ref):
        xc = jnp.clip(x_ref[0], 0.0, 1.0)               # (H, CW)  torch.clip
        yv = y_ref[0]                                   # (H, CW)

        # Center so E[uu] - mu^2 style cancellations stay well conditioned.
        u = xc - 0.5
        v = yv - 0.5

        # Five statistics stacked along the LANE axis -> one row-pass matmul
        # with K = H (no kron(I5, A) zero waste); rows >= Ho of `a` are zero.
        stats = jnp.concatenate([u, v, u * u, v * v, u * v], axis=1)  # (H, 5CW)
        t = jnp.dot(a_ref[...], stats,
                    preferred_element_type=jnp.float32,
                    precision=jax.lax.Precision.HIGHEST)              # (Hp, 5CW)

        # Column "valid" Gaussian conv as K lane-shifted FMAs (VPU/XLU slots,
        # MXU-free).  Windows never cross a stat-group boundary because only
        # columns with (col % W) < Wo are kept below.
        acc = gauss[0] * t[:, 0:width]
        for k in range(1, K):
            acc = acc + gauss[k] * t[:, k:k + width]                  # (Hp, 5CW-K+1)

        # Per-stat views: lane offsets are multiples of CW (vreg aligned when
        # CW % 128 == 0).
        mu_u = acc[:, 0 * CW:0 * CW + CWv]
        mu_v = acc[:, 1 * CW:1 * CW + CWv]
        e_uu = acc[:, 2 * CW:2 * CW + CWv]
        e_vv = acc[:, 3 * CW:3 * CW + CWv]
        e_uv = acc[:, 4 * CW:4 * CW + CWv]

        mu_x = mu_u + 0.5
        mu_y = mu_v + 0.5
        s_xx = e_uu - mu_u * mu_u
        s_yy = e_vv - mu_v * mu_v
        s_xy = e_uv - mu_u * mu_v

        c1 = K1 * K1
        c2 = K2 * K2
        cs = (2.0 * s_xy + c2) * pl.reciprocal(s_xx + s_yy + c2, approx=True)
        lum = (2.0 * mu_x * mu_y + c1) * pl.reciprocal(
            mu_x * mu_x + mu_y * mu_y + c1, approx=True)
        ss = lum * cs                                                 # (Hp, CWv)

        # Mask: padded band-matrix rows (>= Ho), column windows straddling an
        # image boundary ((col % W) >= Wo) and, only when N*C was padded,
        # dummy images in the last block.
        row_i = jax.lax.broadcasted_iota(jnp.int32, ss.shape, 0)
        col_i = jax.lax.broadcasted_iota(jnp.int32, ss.shape, 1)
        valid = (row_i < Ho) & ((col_i % W) < Wo)
        l1_map = jnp.abs(xc - yv)                                     # (H, CW)
        if need_image_mask:
            n_valid = jnp.where(pl.program_id(0) == G - 1, last_valid, chunk)
            valid = valid & ((col_i // W) < n_valid)
            l1_col = jax.lax.broadcasted_iota(jnp.int32, l1_map.shape, 1)
            l1_map = jnp.where((l1_col // W) < n_valid, l1_map, 0.0)

        # Per-block partial sums; normalization happens in plain JAX.
        ssim_ref[0, 0] = jnp.sum(jnp.where(valid, ss, 0.0))
        l1_ref[0, 0] = jnp.sum(l1_map)

    return kernel


# ----------------------------------------------------------------------------
# Wrapper
# ----------------------------------------------------------------------------
@jax.jit
def rc_loss(x, y):
    """x, y: (N, C, H, W) float32; y assumed in [0, 1], x clipped in-kernel."""
    N, C, H, W = x.shape
    # piq.SSIMLoss pre-downsamples by f = max(1, round(min(H, W) / 256));
    # f == 1 for these shapes so it is a no-op.
    # TODO(synk): implement piq's avg_pool2d pre-downsample for min(H, W) >= 384.

    Ho = H - KERNEL_SIZE + 1
    Wo = W - KERNEL_SIZE + 1
    Hp = -(-Ho // 8) * 8                     # sublane-aligned per-stat height
    NC = N * C

    vmem_bytes, n_cores = _tpu_budget()
    chunk, G = _choose_chunk(NC, H, W, vmem_bytes, n_cores)
    NCp = G * chunk
    last_valid = NC - (G - 1) * chunk        # real images in the final block
    CW = chunk * W

    g_np = _gaussian_1d_np(KERNEL_SIZE, KERNEL_SIGMA)
    a_pad = jnp.asarray(_row_band_matrix_np(Ho, Hp, H, g_np))       # (Hp, H)

    # Lane-dense layout: `chunk` images concatenated along the lane axis.
    # TODO(synk): at production sizes fuse this transpose into the producer
    # (it is an extra HBM read+write of x and y; negligible at 16x16).
    def relayout(t):
        t = t.reshape(NC, H, W).astype(jnp.float32)
        if NCp != NC:                        # pad awkward N*C with dummy images
            t = jnp.concatenate(
                [t, jnp.zeros((NCp - NC, H, W), jnp.float32)], axis=0)
        return t.reshape(G, chunk, H, W).transpose(0, 2, 1, 3).reshape(G, H, CW)

    xf = relayout(x)
    yf = relayout(y)

    kernel = _build_kernel(H=H, W=W, Ho=Ho, Wo=Wo, Hp=Hp, CW=CW, chunk=chunk,
                           G=G, last_valid=last_valid,
                           gauss=tuple(float(v) for v in g_np))

    # Per-generation scoped-VMEM budget (v5e/v6e: 128 MiB phys, v7x: 64 MiB).
    vmem_limit = min(int(vmem_bytes * 3 // 4), 96 * 1024 * 1024)

    ssim_parts, l1_parts = pl.pallas_call(
        kernel,
        out_shape=(jax.ShapeDtypeStruct((G, 1), jnp.float32),
                   jax.ShapeDtypeStruct((G, 1), jnp.float32)),
        grid_spec=pltpu.PrefetchScalarGridSpec(
            num_scalar_prefetch=0,
            grid=(G,),
            in_specs=[
                pl.BlockSpec((1, H, CW), lambda i: (i, 0, 0)),
                pl.BlockSpec((1, H, CW), lambda i: (i, 0, 0)),
                pl.BlockSpec((Hp, H), lambda i: (0, 0)),
            ],
            out_specs=[
                pl.BlockSpec((1, 1), lambda i: (i, 0),
                             memory_space=pltpu.MemorySpace.SMEM),
                pl.BlockSpec((1, 1), lambda i: (i, 0),
                             memory_space=pltpu.MemorySpace.SMEM),
            ],
        ),
        compiler_params=pltpu.CompilerParams(
            dimension_semantics=("parallel",),
            vmem_limit_bytes=vmem_limit),
    )(xf, yf, a_pad)

    ssim_mean = jnp.sum(ssim_parts) / (NC * Ho * Wo)   # mean SSIM (n, c, spatial)
    l1_mean = jnp.sum(l1_parts) / (NC * H * W)         # mean |clip(x) - y|
    return 0.1 * (1.0 - ssim_mean) + l1_mean


# ----------------------------------------------------------------------------
# Pure-JAX reference (mirrors piq.SSIMLoss + nn.L1Loss)
# ----------------------------------------------------------------------------
def _ref_rc_loss(x, y):
    N, C, H, W = x.shape
    xc = jnp.clip(x, 0.0, 1.0)
    coords = jnp.arange(KERNEL_SIZE, dtype=jnp.float32) - (KERNEL_SIZE - 1) / 2.0
    g2 = jnp.exp(-(coords[None, :] ** 2 + coords[:, None] ** 2)
                 / (2.0 * KERNEL_SIGMA ** 2))
    g2 = g2 / jnp.sum(g2)
    kern = jnp.tile(g2[None, None], (C, 1, 1, 1))           # (C, 1, K, K)

    def conv(t):
        return jax.lax.conv_general_dilated(
            t, kern, window_strides=(1, 1), padding="VALID",
            dimension_numbers=("NCHW", "OIHW", "NCHW"),
            feature_group_count=C, precision=jax.lax.Precision.HIGHEST)

    mu_x, mu_y = conv(xc), conv(y)
    mu_xx, mu_yy, mu_xy = mu_x * mu_x, mu_y * mu_y, mu_x * mu_y
    sxx = conv(xc * xc) - mu_xx
    syy = conv(y * y) - mu_yy
    sxy = conv(xc * y) - mu_xy
    c1, c2 = K1 * K1, K2 * K2
    cs = (2.0 * sxy + c2) / (sxx + syy + c2)
    ss = (2.0 * mu_xy + c1) / (mu_xx + mu_yy + c1) * cs
    ssim_val = jnp.mean(ss.mean(axis=(-1, -2)))
    l1 = jnp.mean(jnp.abs(xc - y))
    return 0.1 * (1.0 - ssim_val) + l1


if __name__ == "__main__":
    key = jax.random.PRNGKey(0)
    kx, ky = jax.random.split(key)
    N, C, H, W = 2, 4, 16, 16
    # x slightly out of [0,1] so the clip matters; y in [0,1] (piq requirement).
    x = jax.random.uniform(kx, (N, C, H, W), jnp.float32, -0.2, 1.2)
    y = jax.random.uniform(ky, (N, C, H, W), jnp.float32, 0.0, 1.0)

    loss = jax.block_until_ready(rc_loss(x, y))
    ref = jax.block_until_ready(_ref_rc_loss(x, y))
    np.testing.assert_allclose(np.asarray(loss), np.asarray(ref),
                               rtol=1e-3, atol=1e-4)
    print("KERNEL_OK")
</pallas_src>

<mosaic_0001>
module attributes {stable_mosaic.version = 11 : i64} {
  func.func @kernel(%arg0: i32, %arg1: memref<1x16x128xf32, #tpu.memory_space<vmem>>, %arg2: memref<1x16x128xf32, #tpu.memory_space<vmem>>, %arg3: memref<8x16xf32, #tpu.memory_space<vmem>>, %arg4: memref<1x1xf32, #tpu.memory_space<smem>>, %arg5: memref<1x1xf32, #tpu.memory_space<smem>>) attributes {dimension_semantics = [#tpu.dimension_semantics<parallel>], iteration_bounds = array<i64: 1>, scalar_prefetch = 0 : i64, scratch_operands = 0 : i64, tpu.core_type = #tpu.core_type<tc>, window_params = [{transform_indices = @transform_0, window_bounds = array<i64: 1, 16, 128>}, {transform_indices = @transform_1, window_bounds = array<i64: 1, 16, 128>}, {pipeline_mode = #tpu.pipeline_mode<synchronous>, transform_indices = @transform_2, window_bounds = array<i64: 8, 16>}, {transform_indices = @transform_3, window_bounds = array<i64: 1, 1>}, {transform_indices = @transform_4, window_bounds = array<i64: 1, 1>}]} {
    %c0 = arith.constant 0 : index
    %c0_0 = arith.constant 0 : index
    %c0_1 = arith.constant 0 : index
    %0 = vector.load %arg1[%c0, %c0_0, %c0_1] : memref<1x16x128xf32, #tpu.memory_space<vmem>>, vector<1x16x128xf32>
    %1 = vector.shape_cast %0 : vector<1x16x128xf32> to vector<16x128xf32>
    %cst = arith.constant 0.000000e+00 : f32
    %cst_2 = arith.constant 1.000000e+00 : f32
    %2 = vector.broadcast %cst : f32 to vector<16x128xf32>
    %3 = arith.maximumf %2, %1 : vector<16x128xf32>
    %4 = vector.broadcast %cst_2 : f32 to vector<16x128xf32>
    %5 = arith.minimumf %4, %3 : vector<16x128xf32>
    %c0_3 = arith.constant 0 : index
    %c0_4 = arith.constant 0 : index
    %c0_5 = arith.constant 0 : index
    %6 = vector.load %arg2[%c0_3, %c0_4, %c0_5] : memref<1x16x128xf32, #tpu.memory_space<vmem>>, vector<1x16x128xf32>
    %7 = vector.shape_cast %6 : vector<1x16x128xf32> to vector<16x128xf32>
    %cst_6 = arith.constant 5.000000e-01 : f32
    %8 = vector.broadcast %cst_6 : f32 to vector<16x128xf32>
    %9 = arith.subf %5, %8 : vector<16x128xf32>
    %cst_7 = arith.constant 5.000000e-01 : f32
    %10 = vector.broadcast %cst_7 : f32 to vector<16x128xf32>
    %11 = arith.subf %7, %10 : vector<16x128xf32>
    %12 = arith.mulf %9, %9 : vector<16x128xf32>
    %13 = arith.mulf %11, %11 : vector<16x128xf32>
    %14 = arith.mulf %9, %11 : vector<16x128xf32>
    %15 = tpu.concatenate %9, %11, %12, %13, %14 in 1 : vector<16x128xf32>, vector<16x128xf32>, vector<16x128xf32>, vector<16x128xf32>, vector<16x128xf32> -> vector<16x640xf32>
    %c0_8 = arith.constant 0 : index
    %c0_9 = arith.constant 0 : index
    %16 = vector.load %arg3[%c0_8, %c0_9] : memref<8x16xf32, #tpu.memory_space<vmem>>, vector<8x16xf32>
    %cst_10 = arith.constant dense<0.000000e+00> : vector<8x640xf32>
    %17 = tpu.matmul %16, %15, %cst_10 {dimension_numbers = #tpu.dot_dimension_numbers<[1], [0], [0], [1], [0, 0, 1, 1], [], []>, precision = #tpu.contract_precision<fp32>} : vector<8x16xf32>, vector<16x640xf32>, vector<8x640xf32> -> vector<8x640xf32>
    %18 = vector.extract_strided_slice %17 {offsets = [0, 0], sizes = [8, 630], strides = [1, 1]} : vector<8x640xf32> to vector<8x630xf32>
    %cst_11 = arith.constant 0.00102838012 : f32
    %19 = vector.broadcast %cst_11 : f32 to vector<8x630xf32>
    %20 = arith.mulf %19, %18 : vector<8x630xf32>
    %21 = vector.extract_strided_slice %17 {offsets = [0, 1], sizes = [8, 630], strides = [1, 1]} : vector<8x640xf32> to vector<8x630xf32>
    %cst_12 = arith.constant 0.00759875821 : f32
    %22 = vector.broadcast %cst_12 : f32 to vector<8x630xf32>
    %23 = arith.mulf %22, %21 : vector<8x630xf32>
    %24 = arith.addf %20, %23 : vector<8x630xf32>
    %25 = vector.extract_strided_slice %17 {offsets = [0, 2], sizes = [8, 630], strides = [1, 1]} : vector<8x640xf32> to vector<8x630xf32>
    %cst_13 = arith.constant 0.0360007733 : f32
    %26 = vector.broadcast %cst_13 : f32 to vector<8x630xf32>
    %27 = arith.mulf %26, %25 : vector<8x630xf32>
    %28 = arith.addf %24, %27 : vector<8x630xf32>
    %29 = vector.extract_strided_slice %17 {offsets = [0, 3], sizes = [8, 630], strides = [1, 1]} : vector<8x640xf32> to vector<8x630xf32>
    %cst_14 = arith.constant 0.109360687 : f32
    %30 = vector.broadcast %cst_14 : f32 to vector<8x630xf32>
    %31 = arith.mulf %30, %29 : vector<8x630xf32>
    %32 = arith.addf %28, %31 : vector<8x630xf32>
    %33 = vector.extract_strided_slice %17 {offsets = [0, 4], sizes = [8, 630], strides = [1, 1]} : vector<8x640xf32> to vector<8x630xf32>
    %cst_15 = arith.constant 0.213005543 : f32
    %34 = vector.broadcast %cst_15 : f32 to vector<8x630xf32>
    %35 = arith.mulf %34, %33 : vector<8x630xf32>
    %36 = arith.addf %32, %35 : vector<8x630xf32>
    %37 = vector.extract_strided_slice %17 {offsets = [0, 5], sizes = [8, 630], strides = [1, 1]} : vector<8x640xf32> to vector<8x630xf32>
    %cst_16 = arith.constant 0.266011715 : f32
    %38 = vector.broadcast %cst_16 : f32 to vector<8x630xf32>
    %39 = arith.mulf %38, %37 : vector<8x630xf32>
    %40 = arith.addf %36, %39 : vector<8x630xf32>
    %41 = vector.extract_strided_slice %17 {offsets = [0, 6], sizes = [8, 630], strides = [1, 1]} : vector<8x640xf32> to vector<8x630xf32>
    %cst_17 = arith.constant 0.213005543 : f32
    %42 = vector.broadcast %cst_17 : f32 to vector<8x630xf32>
    %43 = arith.mulf %42, %41 : vector<8x630xf32>
    %44 = arith.addf %40, %43 : vector<8x630xf32>
    %45 = vector.extract_strided_slice %17 {offsets = [0, 7], sizes = [8, 630], strides = [1, 1]} : vector<8x640xf32> to vector<8x630xf32>
    %cst_18 = arith.constant 0.109360687 : f32
    %46 = vector.broadcast %cst_18 : f32 to vector<8x630xf32>
    %47 = arith.mulf %46, %45 : vector<8x630xf32>
    %48 = arith.addf %44, %47 : vector<8x630xf32>
    %49 = vector.extract_strided_slice %17 {offsets = [0, 8], sizes = [8, 630], strides = [1, 1]} : vector<8x640xf32> to vector<8x630xf32>
    %cst_19 = arith.constant 0.0360007733 : f32
    %50 = vector.broadcast %cst_19 : f32 to vector<8x630xf32>
    %51 = arith.mulf %50, %49 : vector<8x630xf32>
    %52 = arith.addf %48, %51 : vector<8x630xf32>
    %53 = vector.extract_strided_slice %17 {offsets = [0, 9], sizes = [8, 630], strides = [1, 1]} : vector<8x640xf32> to vector<8x630xf32>
    %cst_20 = arith.constant 0.00759875821 : f32
    %54 = vector.broadcast %cst_20 : f32 to vector<8x630xf32>
    %55 = arith.mulf %54, %53 : vector<8x630xf32>
    %56 = arith.addf %52, %55 : vector<8x630xf32>
    %57 = vector.extract_strided_slice %17 {offsets = [0, 10], sizes = [8, 630], strides = [1, 1]} : vector<8x640xf32> to vector<8x630xf32>
    %cst_21 = arith.constant 0.00102838012 : f32
    %58 = vector.broadcast %cst_21 : f32 to vector<8x630xf32>
    %59 = arith.mulf %58, %57 : vector<8x630xf32>
    %60 = arith.addf %56, %59 : vector<8x630xf32>
    %61 = vector.extract_strided_slice %60 {offsets = [0, 0], sizes = [8, 118], strides = [1, 1]} : vector<8x630xf32> to vector<8x118xf32>
    %62 = vector.extract_strided_slice %60 {offsets = [0, 128], sizes = [8, 118], strides = [1, 1]} : vector<8x630xf32> to vector<8x118xf32>
    %63 = vector.extract_strided_slice %60 {offsets = [0, 256], sizes = [8, 118], strides = [1, 1]} : vector<8x630xf32> to vector<8x118xf32>
    %64 = vector.extract_strided_slice %60 {offsets = [0, 384], sizes = [8, 118], strides = [1, 1]} : vector<8x630xf32> to vector<8x118xf32>
    %65 = vector.extract_strided_slice %60 {offsets = [0, 512], sizes = [8, 118], strides = [1, 1]} : vector<8x630xf32> to vector<8x118xf32>
    %cst_22 = arith.constant 5.000000e-01 : f32
    %66 = vector.broadcast %cst_22 : f32 to vector<8x118xf32>
    %67 = arith.addf %61, %66 : vector<8x118xf32>
    %cst_23 = arith.constant 5.000000e-01 : f32
    %68 = vector.broadcast %cst_23 : f32 to vector<8x118xf32>
    %69 = arith.addf %62, %68 : vector<8x118xf32>
    %70 = arith.mulf %61, %61 : vector<8x118xf32>
    %71 = arith.subf %63, %70 : vector<8x118xf32>
    %72 = arith.mulf %62, %62 : vector<8x118xf32>
    %73 = arith.subf %64, %72 : vector<8x118xf32>
    %74 = arith.mulf %61, %62 : vector<8x118xf32>
    %75 = arith.subf %65, %74 : vector<8x118xf32>
    %cst_24 = arith.constant 2.000000e+00 : f32
    %76 = vector.broadcast %cst_24 : f32 to vector<8x118xf32>
    %77 = arith.mulf %76, %75 : vector<8x118xf32>
    %cst_25 = arith.constant 8.99999984E-4 : f32
    %78 = vector.broadcast %cst_25 : f32 to vector<8x118xf32>
    %79 = arith.addf %77, %78 : vector<8x118xf32>
    %80 = arith.addf %71, %73 : vector<8x118xf32>
    %cst_26 = arith.constant 8.99999984E-4 : f32
    %81 = vector.broadcast %cst_26 : f32 to vector<8x118xf32>
    %82 = arith.addf %80, %81 : vector<8x118xf32>
    %83 = tpu.reciprocal %82 {approx = true} : vector<8x118xf32> -> vector<8x118xf32>
    %84 = arith.mulf %79, %83 : vector<8x118xf32>
    %cst_27 = arith.constant 2.000000e+00 : f32
    %85 = vector.broadcast %cst_27 : f32 to vector<8x118xf32>
    %86 = arith.mulf %85, %67 : vector<8x118xf32>
    %87 = arith.mulf %86, %69 : vector<8x118xf32>
    %cst_28 = arith.constant 9.99999974E-5 : f32
    %88 = vector.broadcast %cst_28 : f32 to vector<8x118xf32>
    %89 = arith.addf %87, %88 : vector<8x118xf32>
    %90 = arith.mulf %67, %67 : vector<8x118xf32>
    %91 = arith.mulf %69, %69 : vector<8x118xf32>
    %92 = arith.addf %90, %91 : vector<8x118xf32>
    %cst_29 = arith.constant 9.99999974E-5 : f32
    %93 = vector.broadcast %cst_29 : f32 to vector<8x118xf32>
    %94 = arith.addf %92, %93 : vector<8x118xf32>
    %95 = tpu.reciprocal %94 {approx = true} : vector<8x118xf32> -> vector<8x118xf32>
    %96 = arith.mulf %89, %95 : vector<8x118xf32>
    %97 = arith.mulf %96, %84 : vector<8x118xf32>
    %98 = tpu.iota {dimensions = array<i32: 0>} : vector<8x118xi32>
    %99 = tpu.iota {dimensions = array<i32: 1>} : vector<8x118xi32>
    %c6_i32 = arith.constant 6 : i32
    %100 = vector.broadcast %c6_i32 : i32 to vector<8x118xi32>
    %101 = arith.cmpi slt, %98, %100 : vector<8x118xi32>
    %c16_i32 = arith.constant 16 : i32
    %c0_i32 = arith.constant 0 : i32
    %102 = arith.cmpi eq, %c16_i32, %c0_i32 : i32
    %c1_i32 = arith.constant 1 : i32
    %103 = arith.select %102, %c1_i32, %c16_i32 : i32
    %104 = vector.broadcast %103 : i32 to vector<8x118xi32>
    %105 = arith.remsi %99, %104 : vector<8x118xi32>
    %c0_i32_30 = arith.constant 0 : i32
    %106 = vector.broadcast %c0_i32_30 : i32 to vector<8x118xi32>
    %107 = arith.cmpi ne, %105, %106 : vector<8x118xi32>
    %c0_i32_31 = arith.constant 0 : i32
    %108 = vector.broadcast %c0_i32_31 : i32 to vector<8x118xi32>
    %109 = arith.cmpi slt, %105, %108 : vector<8x118xi32>
    %c0_i32_32 = arith.constant 0 : i32
    %110 = arith.cmpi slt, %103, %c0_i32_32 : i32
    %111 = vector.broadcast %110 : i1 to vector<8x118xi1>
    %112 = vector.broadcast %111 : vector<8x118xi1> to vector<8x118xi1>
    %113 = arith.xori %109, %112 : vector<8x118xi1>
    %114 = arith.andi %113, %107 : vector<8x118xi1>
    %115 = vector.broadcast %103 : i32 to vector<8x118xi32>
    %116 = arith.addi %105, %115 : vector<8x118xi32>
    %117 = arith.select %114, %116, %105 : vector<8x118xi1>, vector<8x118xi32>
    %c6_i32_33 = arith.constant 6 : i32
    %118 = vector.broadcast %c6_i32_33 : i32 to vector<8x118xi32>
    %119 = arith.cmpi slt, %117, %118 : vector<8x118xi32>
    %120 = arith.andi %101, %119 : vector<8x118xi1>
    %121 = arith.subf %5, %7 : vector<16x128xf32>
    %122 = math.absf %121 : vector<16x128xf32>
    %cst_34 = arith.constant 0.000000e+00 : f32
    %123 = vector.broadcast %cst_34 : f32 to vector<8x118xf32>
    %124 = arith.select %120, %97, %123 : vector<8x118xi1>, vector<8x118xf32>
    %125 = vector.shape_cast %124 : vector<8x118xf32> to vector<1x8x118xf32>
    %cst_35 = arith.constant dense<0.000000e+00> : vector<1xf32>
    %126 = vector.multi_reduction <add>, %125, %cst_35 [1, 2] : vector<1x8x118xf32> to vector<1xf32>
    %127 = vector.shape_cast %126 : vector<1xf32> to vector<1x1x1xf32>
    %128 = vector.extract %127[0, 0, 0] : f32 from vector<1x1x1xf32>
    %c0_36 = arith.constant 0 : index
    %c0_37 = arith.constant 0 : index
    %129 = memref.load %arg4[%c0_36, %c0_37] : memref<1x1xf32, #tpu.memory_space<smem>>
    memref.store %128, %arg4[%c0_36, %c0_37] : memref<1x1xf32, #tpu.memory_space<smem>>
    %130 = vector.shape_cast %122 : vector<16x128xf32> to vector<1x16x128xf32>
    %cst_38 = arith.constant dense<0.000000e+00> : vector<1xf32>
    %131 = vector.multi_reduction <add>, %130, %cst_38 [1, 2] : vector<1x16x128xf32> to vector<1xf32>
    %132 = vector.shape_cast %131 : vector<1xf32> to vector<1x1x1xf32>
    %133 = vector.extract %132[0, 0, 0] : f32 from vector<1x1x1xf32>
    %c0_39 = arith.constant 0 : index
    %c0_40 = arith.constant 0 : index
    %134 = memref.load %arg5[%c0_39, %c0_40] : memref<1x1xf32, #tpu.memory_space<smem>>
    memref.store %133, %arg5[%c0_39, %c0_40] : memref<1x1xf32, #tpu.memory_space<smem>>
    return
  }
  func.func @transform_0(%arg0: i32) -> (i32, i32, i32) {
    %c0_i32 = arith.constant 0 : i32
    %c0_i32_0 = arith.constant 0 : i32
    %c0_i32_1 = arith.constant 0 : i32
    return %arg0, %c0_i32, %c0_i32_0 : i32, i32, i32
  }
  func.func @transform_1(%arg0: i32) -> (i32, i32, i32) {
    %c0_i32 = arith.constant 0 : i32
    %c0_i32_0 = arith.constant 0 : i32
    %c0_i32_1 = arith.constant 0 : i32
    return %arg0, %c0_i32, %c0_i32_0 : i32, i32, i32
  }
  func.func @transform_2(%arg0: i32) -> (i32, i32) {
    %c0_i32 = arith.constant 0 : i32
    %c0_i32_0 = arith.constant 0 : i32
    %c0_i32_1 = arith.constant 0 : i32
    return %c0_i32, %c0_i32_0 : i32, i32
  }
  func.func @transform_3(%arg0: i32) -> (i32, i32) {
    %c0_i32 = arith.constant 0 : i32
    %c0_i32_0 = arith.constant 0 : i32
    return %arg0, %c0_i32 : i32, i32
  }
  func.func @transform_4(%arg0: i32) -> (i32, i32) {
    %c0_i32 = arith.constant 0 : i32
    %c0_i32_0 = arith.constant 0 : i32
    return %arg0, %c0_i32 : i32, i32
  }
}

</mosaic_0001>

<bundles_post_ra>
// kernel: rc_loss.1
= control target key start
LH: loop header
LB: loop body
LE: loop exit
PB: predicated region body
PF: predicated region fallthrough
CT: control target
= control target key end

     0   :  { %10 = vsyncpa [#allocation3], 0  ;;  %vm37_vm0 = vcmask 130048   ;;  %v2096_v7 = vmov 0.0   ;;  %s2463_s0 = inlined_call_operand.vmem [shape: f32[1,16,128], index: 0, kind: input, shape index: {}]   ;;  %s2464_s1 = inlined_call_operand.vmem [shape: f32[1,16,128], index: 1, kind: input, shape index: {}]   ;;  %s2465_s2 = inlined_call_operand.vmem [shape: f32[8,16], index: 2, kind: input, shape index: {}]   ;;  %s2466_s3 = inlined_call_operand.hbm [shape: f32[1,1], index: 3, kind: output, shape index: {0}]   ;;  %s2467_s4 = inlined_call_operand.hbm [shape: f32[1,1], index: 4, kind: output, shape index: {1}]  }
   0x1   :  { %v2139_v0 = vld [vmem:[%s2464_s1] sm:$0xff]  ;;  %v2144_v1 = vld [vmem:[%s2464_s1 + $0x8] sm:$0xff]  ;;  %109 = vmatprep.mubr.f32.mxu1 %v2096_v7  ;;  %362 = vmatprep.mubr.f32.mxu0 %v2096_v7 }
   0x2   :  { %v18_v2 = vld [vmem:[%s2463_s0] sm:$0xff]  ;;  %v1891_v3 = vadd.f32 -0.5, %v2139_v0  ;;  %v1892_v4 = vadd.f32 -0.5, %v2144_v1  ;;  %v19_v5 = vld [vmem:[%s2463_s0 + $0x8] sm:$0xff] }
   0x3   :  { %v20_v6 = vmax.f32 %v18_v2, 0.0  ;;  %v36_v8 = vld [vmem:[%s2465_s2] sm:$0xff]  ;;  %v21_v9 = vmax.f32 %v19_v5, 0.0 }
   0x4   :  { %v39_v10 = vsel %vm37_vm0, %v36_v8, 0 }
   0x5   :  { %11 = vsyncpa [#allocation5], 0  ;;  %v41_v11 = vand.u32 4294901760, %v1891_v3  ;;  %v45_v12 = vand.u32 4294901760, %v1892_v4  ;;  %v2159_v13 = vmin.f32 %v20_v6, 1.0  ;;  %v2161_v14 = vand.u32 4294901760, %v39_v10 }
   0x6   :  { %v2163_v15 = vmin.f32 %v21_v9, 1.0  ;;  %v2165_v16 = vmul.f32 %v1891_v3, %v1891_v3  ;;  %v2167_v17 = vmul.f32 %v1892_v4, %v1892_v4  ;;  %vm2098_vm1 = vmmov 0   ;;  %s2099_s0 = smov 126   ;;  %s2100_s2 = smov 127  }
   0x7   :  { %v1953_v18 = vpack.c.bf16 %v45_v12, %v41_v11  ;;  %v2169_v19 = vsub.f32 %v1891_v3, %v41_v11  ;;  %v2171_v20 = vsub.f32 %v1892_v4, %v45_v12  ;;  %v1889_v21 = vadd.f32 -0.5, %v2159_v13  ;;  %s2101_s24 = smov 124   ;;  %s2102_s25 = smov 125  }
   0x8   :  { %v1890_v22 = vadd.f32 -0.5, %v2163_v15  ;;  %v2176_v23 = vsub.f32 %v39_v10, %v2161_v14  ;;  %v532_v24 = vand.u32 4294901760, %v2165_v16  ;;  %v536_v30 = vand.u32 4294901760, %v2167_v17  ;;  %s2103_s26 = smov 122   ;;  %s2104_s27 = smov 123  }
   0x9   :  { %1954 = vmatprep.subr.bf16.mxu1 %v1953_v18  ;;  %1966 = vmatprep.subr.bf16.mxu0 %v1953_v18  ;;  %v43_v25 = vand.u32 4294901760, %v1889_v21  ;;  %v123_v26 = vand.u32 4294901760, %v2169_v19  ;;  %v135_v27 = vand.u32 4294901760, %v2171_v20  ;;  %v30_v42 = vmul.f32 %v1889_v21, %v1889_v21  ;;  %s2105_s28 = smov 120   ;;  %s2106_s29 = smov 121  }
   0xa   :  { %v47_v28 = vand.u32 4294901760, %v1890_v22  ;;  %v2182_v29 = vand.u32 4294901760, %v2176_v23  ;;  %v2190_v38 = vsub.f32 %v2165_v16, %v532_v24  ;;  %v2195_v45 = vsub.f32 %v2167_v17, %v536_v30  ;;  %s2107_s30 = smov 119   ;;  %s2108_s5 = smov 118  }
   0xb   :  { %v128_v31 = vsub.f32 %v1889_v21, %v43_v25  ;;  %v124_v32 = vsub.f32 %v2169_v19, %v123_v26  ;;  %v136_v33 = vsub.f32 %v2171_v20, %v135_v27  ;;  %v1969_v34 = vpack.c.bf16 %v135_v27, %v123_v26  ;;  %s2072_s10 = scalar_lea.hbm %s2466_s3, 16 }
   0xc   :  { %v1955_v35 = vpack.c.bf16 %v47_v28, %v43_v25  ;;  %v140_v36 = vsub.f32 %v1890_v22, %v47_v28  ;;  %v113_v37 = vsub.f32 %v2176_v23, %v2182_v29  ;;  %v31_v46 = vmul.f32 %v1890_v22, %v1890_v22  ;;  %p2073_p0 = scmp.ne.s32.totalorder %s2466_s3, %s2072_s10  ;;  %p2076_p1 = scmp.lt.u32.totalorder %s2072_s10, %s2466_s3 }
   0xd   :  { %v125_v39 = vand.u32 4294901760, %v124_v32  ;;  %v137_v40 = vand.u32 4294901760, %v136_v33  ;;  %v129_v41 = vand.u32 4294901760, %v128_v31  ;;  %v534_v49 = vand.u32 4294901760, %v30_v42 }
   0xe   :  { %1956 = vmatpush1.bf16.msra.mxu1 %v1955_v35  ;;  %1968 = vmatpush1.bf16.msra.mxu0 %v1955_v35  ;;  %v2192_v43 = vand.u32 4294901760, %v113_v37  ;;  %v141_v44 = vand.u32 4294901760, %v140_v36  ;;  %v34_v50 = vmul.f32 %v1891_v3, %v1889_v21  ;;  %v538_v53 = vand.u32 4294901760, %v31_v46  ;;  %p2078_p2 = pnand %p2076_p1, %p2073_p0 }
   0xf   :  { %v1957_v47 = vpack.c.bf16 %v137_v40, %v125_v39  ;;  %1970 = vmatprep.subr.bf16.mxu0 %v1969_v34  ;;  %v130_v48 = vsub.f32 %v128_v31, %v129_v41  ;;  %v35_v54 = vmul.f32 %v1892_v4, %v1890_v22  ;;  %v2199_v56 = vsub.f32 %v30_v42, %v534_v49 }
  0x10   :  { %v142_v51 = vsub.f32 %v140_v36, %v141_v44  ;;  %v1971_v52 = vpack.c.bf16 %v141_v44, %v129_v41  ;;  %v1024_v57 = vand.u32 4294901760, %v34_v50  ;;  %v2201_v59 = vsub.f32 %v31_v46, %v538_v53 }
  0x11   :  { %115 = vmatmul.mubr.f32.vlgmr.msra.gmra.mrb[0].mxu1 %v2192_v43  ;;  %366 = vmatmul.mubr.f32.vlgmr.msra.gmra.mrb[0].mxu0 %v2182_v29  ;;  %v131_v55 = vand.u32 4294901760, %v130_v48  ;;  %v1027_v60 = vand.u32 4294901760, %v35_v54  ;;  %v1961_v61 = vpack.c.bf16 %v2171_v20, %v2169_v19  ;;  %v614_v3 = vand.u32 4294901760, %v2190_v38 }
  0x12   :  { %1958 = vmatprep.subr.bf16.mxu1 %v1957_v47  ;;  %v143_v58 = vand.u32 4294901760, %v142_v51  ;;  %1972 = vmatpush1.bf16.msra.mxu0 %v1971_v52  ;;  %v2207_v62 = vsub.f32 %v34_v50, %v1024_v57  ;;  %v626_v4 = vand.u32 4294901760, %v2195_v45  ;;  %v620_v5 = vand.u32 4294901760, %v2199_v56 }
  0x13   :  { %205 = vmatprep.mubr.f32.mxu1 %v2096_v7  ;;  %448 = vmatprep.mubr.f32.mxu0 %v2096_v7  ;;  %v2209_v2 = vsub.f32 %v35_v54, %v1027_v60  ;;  %v1963_v6 = vpack.c.bf16 %v140_v36, %v128_v31  ;;  %v632_v8 = vand.u32 4294901760, %v2201_v59  ;;  %v2217_v11 = vpack.c.bf16 %v536_v30, %v532_v24 }
  0x14   :  { %v1959_v63 = vpack.c.bf16 %v143_v58, %v131_v55  ;;  %1974 = vmatprep.subr.bf16.mxu0 %v1953_v18  ;;  %v1103_v9 = vand.u32 4294901760, %v2207_v62  ;;  %v615_v12 = vsub.f32 %v2190_v38, %v614_v3  ;;  %v627_v16 = vsub.f32 %v2195_v45, %v626_v4 }
  0x15   :  { %v1110_v10 = vand.u32 4294901760, %v2209_v2  ;;  %v621_v17 = vsub.f32 %v2199_v56, %v620_v5  ;;  %v633_v18 = vsub.f32 %v2201_v59, %v632_v8  ;;  %v2097_v21 = vmov 0.0|0.0  }
  0x16   :  { %1960 = vmatpush1.bf16.msra.mxu1 %v1959_v63  ;;  %v1104_v19 = vsub.f32 %v2207_v62, %v1103_v9  ;;  %v616_v22 = vand.u32 4294901760, %v615_v12  ;;  %v628_v24 = vand.u32 4294901760, %v627_v16  ;;  %v1979_v25 = vpack.c.bf16 %v538_v53, %v534_v49 }
  0x17   :  { %1962 = vmatprep.subr.bf16.mxu1 %v1961_v61  ;;  %v1111_v20 = vsub.f32 %v2209_v2, %v1110_v10  ;;  %v2002_v26 = vpack.c.bf16 %v1027_v60, %v1024_v57  ;;  %v622_v27 = vand.u32 4294901760, %v621_v17  ;;  %v634_v28 = vand.u32 4294901760, %v633_v18 }
  0x18   :  { %v1105_v30 = vand.u32 4294901760, %v1104_v19  ;;  %v1981_v32 = vpack.c.bf16 %v628_v24, %v616_v22  ;;  %v1987_v36 = vpack.c.bf16 %v2201_v59, %v2199_v56  ;;  %v2008_v37 = vpack.c.bf16 %v2209_v2, %v2207_v62 }
  0x19   :  { %207 = vmatmul.mubr.f32.vlgmr.msra.gmra.mrb[0].mxu1 %v2161_v14  ;;  %450 = vmatmul.mubr.f32.vlgmr.msra.gmra.mrb[0].mxu0 %v2161_v14  ;;  %v1112_v31 = vand.u32 4294901760, %v1111_v20  ;;  %v1983_v33 = vpack.c.bf16 %v634_v28, %v622_v27  ;;  %v1993_v39 = vpack.c.bf16 %v626_v4, %v614_v3  ;;  %v2014_v40 = vpack.c.bf16 %v1110_v10, %v1103_v9 }
  0x1a   :  { %1964 = vmatpush1.bf16.msra.mxu1 %v1963_v6  ;;  %1976 = vmatpush1.bf16.msra.mxu0 %v1955_v35  ;;  %v1985_v35 = vpack.c.bf16 %v2195_v45, %v2190_v38  ;;  %v1995_v38 = vpack.c.bf16 %v632_v8, %v620_v5  ;;  %v1835_v28 = vsub.f32 %v2159_v13, %v2139_v0  ;;  %vm1507_vm2 = vcmask 1039360  }
  0x1b   :  { %285 = vmatprep.mubr.f32.mxu1 %v2096_v7  ;;  %524 = vmatprep.mubr.f32.mxu0 %v2096_v7  ;;  %v2005_v34 = vpack.c.bf16 %v1112_v31, %v1105_v30  ;;  %v1836_v30 = vsub.f32 %v2163_v15, %v2144_v1  ;;  %vm1542_vm3 = vcmask 1031168   ;;  %vm1577_vm4 = vcmask 1022976  }
  0x1c   :  { %1978 = vmatprep.subr.bf16.mxu1 %v2217_v11  ;;  %2001 = vmatprep.subr.bf16.mxu0 %v2097_v21  ;;  %vm1612_vm5 = vcmask 1014784   ;;  %vm1647_vm6 = vcmask 1006592   ;;  %vm1672_vm7 = vcmask 998400   ;;  %vm1697_vm8 = vcmask 990208  }
  0x1d   :  { %vm1722_vm9 = vcmask 982016   ;;  %vm1747_vm10 = vcmask 973824   ;;  %vm1777_vm11 = vcmask 965632  }
  0x21   :  { %288 = vmatmul.mubr.f32.vlgmr.msra.gmra.mrb[0].mxu1 %v2176_v23  ;;  %526 = vmatmul.mubr.f32.vlgmr.msra.gmra.mrb[0].mxu0 %v2161_v14 }
  0x22   :  { %1980 = vmatpush1.bf16.msra.mxu1 %v1979_v25  ;;  %2003 = vmatpush3.bf16.msra.mxu0 %v2002_v26 }
  0x23   :  { %600 = vmatprep.mubr.f32.mxu1 %v2096_v7  ;;  %1915 = vmatprep.mubr.msk.f32.mxu0 %vm2098_vm1, %v2096_v7 }
  0x24   :  { %1982 = vmatprep.subr.bf16.mxu1 %v1981_v32  ;;  %2004 = vmatprep.subr.bf16.mxu0 %v2097_v21 }
  0x25   :  { %606 = vmatmul.mubr.f32.vlgmr.msra.gmra.mrb[2].mxu1 %v2192_v43  ;;  %1916 = vmatmul.mubr.f32.vlgmr.msra.gmra.mrb[2].mxu0 %v2192_v43 }
  0x26   :  { %1984 = vmatpush1.bf16.msra.mxu1 %v1983_v33  ;;  %2006 = vmatpush3.bf16.msra.mxu0 %v2005_v34  ;;  %v1837_v33 = vand.u32 2147483647, %v1835_v28  ;;  %v1838_v34 = vand.u32 2147483647, %v1836_v30 }
  0x27   :  { %696 = vmatprep.mubr.f32.mxu1 %v2096_v7  ;;  %1922 = vmatprep.mubr.msk.f32.mxu0 %vm2098_vm1, %v2096_v7 }
  0x28   :  { %1986 = vmatprep.subr.bf16.mxu1 %v1985_v35  ;;  %2007 = vmatprep.subr.bf16.mxu0 %v2097_v21 }
  0x2d   :  { %698 = vmatmul.mubr.f32.vlgmr.msra.gmra.mrb[2].mxu1 %v2161_v14  ;;  %1923 = vmatmul.mubr.f32.vlgmr.msra.gmra.mrb[2].mxu0 %v2161_v14 }
  0x2e   :  { %1988 = vmatpush1.bf16.msra.mxu1 %v1987_v36  ;;  %2009 = vmatpush3.bf16.msra.mxu0 %v2008_v37  ;;  %v1852_v37 = vadd.f32 %v1838_v34, %v1837_v33 }
  0x2f   :  { %776 = vmatprep.mubr.f32.mxu1 %v2096_v7  ;;  %1929 = vmatprep.mubr.msk.f32.mxu0 %vm2098_vm1, %v2096_v7 }
  0x30   :  { %1990 = vmatprep.subr.bf16.mxu1 %v2217_v11  ;;  %2010 = vmatprep.subr.bf16.mxu0 %v2097_v21 }
  0x35   :  { %779 = vmatmul.mubr.f32.vlgmr.msra.gmra.mrb[2].mxu1 %v2176_v23  ;;  %1930 = vmatmul.mubr.f32.vlgmr.msra.gmra.mrb[2].mxu0 %v2176_v23 }
  0x36   :  { %1992 = vmatpush1.bf16.msra.mxu1 %v1979_v25  ;;  %2012 = vmatpush3.bf16.msra.mxu0 %v2002_v26 }
  0x37   :  { %853 = vmatprep.mubr.f32.mxu1 %v2096_v7  ;;  %1936 = vmatprep.mubr.msk.f32.mxu0 %vm2098_vm1, %v2096_v7 }
  0x38   :  { %1994 = vmatprep.subr.bf16.mxu1 %v1993_v39  ;;  %2013 = vmatprep.subr.bf16.mxu0 %v2097_v21 }
  0x3d   :  { %857 = vmatmul.mubr.f32.vlgmr.msra.gmra.mrb[2].mxu1 %v2182_v29  ;;  %1937 = vmatmul.mubr.f32.vlgmr.msra.gmra.mrb[2].mxu0 %v2182_v29 }
  0x3e   :  { %1996 = vmatpush1.bf16.msra.mxu1 %v1995_v38  ;;  %2015 = vmatpush3.bf16.msra.mxu0 %v2014_v40 }
  0x3f   :  { %939 = vmatprep.mubr.f32.mxu1 %v2096_v7  ;;  %1943 = vmatprep.mubr.msk.f32.mxu0 %vm2098_vm1, %v2096_v7 }
  0x40   :  { %1998 = vmatprep.subr.bf16.mxu1 %v2217_v11  ;;  %2016 = vmatprep.subr.bf16.mxu0 %v2097_v21 }
  0x45   :  { %941 = vmatmul.mubr.f32.vlgmr.msra.gmra.mrb[2].mxu1 %v2161_v14  ;;  %1944 = vmatmul.mubr.f32.vlgmr.msra.gmra.mrb[2].mxu0 %v2161_v14 }
  0x46   :  { %2000 = vmatpush1.bf16.msra.mxu1 %v1979_v25  ;;  %2018 = vmatpush3.bf16.msra.mxu0 %v2002_v26 }
  0x47   :  { %1015 = vmatprep.mubr.f32.mxu1 %v2096_v7  ;;  %1950 = vmatprep.mubr.msk.f32.mxu0 %vm2098_vm1, %v2096_v7 }
  0x4d   :  { %1017 = vmatmul.mubr.f32.vlgmr.msra.gmra.mrb[2].mxu1 %v2161_v14  ;;  %1951 = vmatmul.mubr.f32.vlgmr.msra.gmra.mrb[2].mxu0 %v2161_v14 }
  0xf4   :  { %v289_v23 = vpop.f32.mrb[0].mxu1  ;;  %v527_v29 = vpop.f32.mrb[0].mxu0 }
  0xf5   :  { %v2019_v41 = vadd.f32 %v527_v29, %v289_v23  ;;  %v291_v42 = vpop.f32.mrb[1].mxu1  ;;  %v529_v43 = vpop.f32.mrb[1].mxu0 }
  0xf6   :  { %v2020_v44 = vadd.f32 %v529_v43, %v291_v42 }
  0xf7   :  { %v1522_v45 = vmul.f32 0.036000773, %v2019_v41  ;;  %v1487_v46 = vmul.f32 0.007598758, %v2019_v41  ;;  %v1592_v47 = vmul.f32 0.21300554, %v2019_v41 }
  0xf8   :  { %v1557_v7 = vmul.f32 0.10936069, %v2019_v41  ;;  %v1627_v14 = vmul.f32 0.26601171, %v2019_v41  ;;  %v2302_v48 = vmul.f32 0.0010283801, %v2019_v41 }
  0xf9   :  { %1532 = vrot.lane.b32.xlu1 %v1522_v45, %s2099_s0  ;;  %1497 = vrot.lane.b32.xlu0 %v1487_v46, %s2100_s2  ;;  %v1558_v49 = vmul.f32 0.10936069, %v2020_v44  ;;  %v1488_v50 = vmul.f32 0.007598758, %v2020_v44  ;;  %v1628_v51 = vmul.f32 0.26601171, %v2020_v44 }
  0xfa   :  { %v1523_v52 = vmul.f32 0.036000773, %v2020_v44  ;;  %v1593_v53 = vmul.f32 0.21300554, %v2020_v44  ;;  %v2316_v54 = vmul.f32 0.0010283801, %v2020_v44 }
  0xfd   :  { %1602 = vrot.lane.b32.xlu1 %v1592_v47, %s2101_s24  ;;  %1567 = vrot.lane.b32.xlu0 %v1557_v7, %s2102_s25 }
 0x101   :  { %1662 = vrot.lane.b32.xlu1 %v1592_v47, %s2103_s26  ;;  %1637 = vrot.lane.b32.xlu0 %v1627_v14, %s2104_s27 }
 0x105   :  { %1712 = vrot.lane.b32.xlu1 %v1522_v45, %s2105_s28  ;;  %1687 = vrot.lane.b32.xlu0 %v1557_v7, %s2106_s29 }
 0x109   :  { %1737 = vrot.lane.b32.xlu0 %v1487_v46, %s2107_s30  ;;  %1767 = vrot.lane.b32.xlu1 %v2302_v48, %s2108_s5 }
 0x10d   :  { %1569 = vrot.lane.b32.xlu1 %v1558_v49, %s2102_s25  ;;  %1499 = vrot.lane.b32.xlu0 %v1488_v50, %s2100_s2 }
 0x111   :  { %1639 = vrot.lane.b32.xlu1 %v1628_v51, %s2104_s27  ;;  %1534 = vrot.lane.b32.xlu0 %v1523_v52, %s2099_s0 }
 0x115   :  { %1689 = vrot.lane.b32.xlu1 %v1558_v49, %s2106_s29  ;;  %1604 = vrot.lane.b32.xlu0 %v1593_v53, %s2101_s24 }
 0x119   :  { %1739 = vrot.lane.b32.xlu1 %v1488_v50, %s2107_s30  ;;  %1664 = vrot.lane.b32.xlu0 %v1593_v53, %s2103_s26 }
 0x11d   :  { %1714 = vrot.lane.b32.xlu0 %v1523_v52, %s2105_s28 }
 0x120   :  { %v1018_v55 = vpop.f32.mrb[2].mxu1  ;;  %v1478_v56 = vpop.f32.mrb[2].mxu0 }
 0x121   :  { %1769 = vrot.lane.b32.xlu0 %v2316_v54, %s2108_s5  ;;  %v1020_v57 = vpop.f32.mrb[3].mxu1  ;;  %v1952_v58 = vpop.f32.mrb[3].mxu0  ;;  %v1489_v59 = vmul.f32 0.007598758, %v1018_v55  ;;  %v1491_v60 = vmul.f32 0.007598758, %v1478_v56 }
 0x122   :  { %v1524_v61 = vmul.f32 0.036000773, %v1018_v55  ;;  %v1559_v62 = vmul.f32 0.10936069, %v1018_v55  ;;  %v1526_v63 = vmul.f32 0.036000773, %v1478_v56 }
 0x123   :  { %1501 = vrot.lane.b32.xlu1 %v1489_v59, %s2100_s2  ;;  %v1561_v2 = vmul.f32 0.10936069, %v1478_v56  ;;  %v1594_v3 = vmul.f32 0.21300554, %v1018_v55  ;;  %v1629_v4 = vmul.f32 0.26601171, %v1018_v55 }
 0x124   :  { %v1596_v5 = vmul.f32 0.21300554, %v1478_v56  ;;  %v1631_v6 = vmul.f32 0.26601171, %v1478_v56  ;;  %v2338_v8 = vmul.f32 0.0010283801, %v1018_v55 }
 0x125   :  { %1505 = vrot.lane.b32.xlu0 %v1491_v60, %s2100_s2  ;;  %v1525_v9 = vmul.f32 0.036000773, %v1020_v57  ;;  %v1490_v10 = vmul.f32 0.007598758, %v1020_v57  ;;  %v1595_v11 = vmul.f32 0.21300554, %v1020_v57 }
 0x126   :  { %v1560_v12 = vmul.f32 0.10936069, %v1020_v57  ;;  %v1630_v16 = vmul.f32 0.26601171, %v1020_v57  ;;  %v2350_v17 = vmul.f32 0.0010283801, %v1020_v57 }
 0x127   :  { %1536 = vrot.lane.b32.xlu1 %v1524_v61, %s2099_s0  ;;  %v2355_v18 = vmul.f32 0.0010283801, %v1478_v56 }
 0x129   :  { %1571 = vrot.lane.b32.xlu0 %v1559_v62, %s2102_s25 }
 0x12b   :  { %1540 = vrot.lane.b32.xlu1 %v1526_v63, %s2099_s0 }
 0x12d   :  { %1575 = vrot.lane.b32.xlu0 %v1561_v2, %s2102_s25 }
 0x12f   :  { %1606 = vrot.lane.b32.xlu1 %v1594_v3, %s2101_s24 }
 0x131   :  { %1641 = vrot.lane.b32.xlu0 %v1629_v4, %s2104_s27 }
 0x133   :  { %1610 = vrot.lane.b32.xlu1 %v1596_v5, %s2101_s24 }
 0x135   :  { %1645 = vrot.lane.b32.xlu0 %v1631_v6, %s2104_s27 }
 0x137   :  { %1666 = vrot.lane.b32.xlu1 %v1594_v3, %s2103_s26 }
 0x139   :  { %1691 = vrot.lane.b32.xlu0 %v1559_v62, %s2106_s29 }
 0x13b   :  { %1670 = vrot.lane.b32.xlu1 %v1596_v5, %s2103_s26 }
 0x13d   :  { %1695 = vrot.lane.b32.xlu0 %v1561_v2, %s2106_s29 }
 0x13f   :  { %1716 = vrot.lane.b32.xlu1 %v1524_v61, %s2105_s28 }
 0x141   :  { %1741 = vrot.lane.b32.xlu0 %v1489_v59, %s2107_s30 }
 0x143   :  { %1720 = vrot.lane.b32.xlu1 %v1526_v63, %s2105_s28 }
 0x145   :  { %1745 = vrot.lane.b32.xlu0 %v1491_v60, %s2107_s30 }
 0x147   :  { %1771 = vrot.lane.b32.xlu1 %v2338_v8, %s2108_s5 }
 0x149   :  { %1538 = vrot.lane.b32.xlu0 %v1525_v9, %s2099_s0 }
 0x14b   :  { %1503 = vrot.lane.b32.xlu1 %v1490_v10, %s2100_s2 }
 0x14d   :  { %1608 = vrot.lane.b32.xlu0 %v1595_v11, %s2101_s24 }
 0x14f   :  { %1573 = vrot.lane.b32.xlu1 %v1560_v12, %s2102_s25 }
 0x151   :  { %1668 = vrot.lane.b32.xlu0 %v1595_v11, %s2103_s26 }
 0x153   :  { %1643 = vrot.lane.b32.xlu1 %v1630_v16, %s2104_s27 }
 0x155   :  { %1718 = vrot.lane.b32.xlu0 %v1525_v9, %s2105_s28 }
 0x157   :  { %1693 = vrot.lane.b32.xlu1 %v1560_v12, %s2106_s29 }
 0x159   :  { %1773 = vrot.lane.b32.xlu0 %v2350_v17, %s2108_s5 }
 0x15b   :  { %1743 = vrot.lane.b32.xlu1 %v1490_v10, %s2107_s30 }
 0x15f   :  { %1775 = vrot.lane.b32.xlu1 %v2355_v18, %s2108_s5 }
 0x16b   :  { %v1533_v19 = vpop.permute.xlu1 %1532  ;;  %v1498_v20 = vpop.permute.xlu0 %1497 }
 0x16f   :  { %v1603_v21 = vpop.permute.xlu1 %1602  ;;  %v1568_v22 = vpop.permute.xlu0 %1567 }
 0x173   :  { %v1663_v24 = vpop.permute.xlu1 %1662  ;;  %v1638_v25 = vpop.permute.xlu0 %1637 }
 0x177   :  { %v1713_v26 = vpop.permute.xlu1 %1712  ;;  %v1688_v27 = vpop.permute.xlu0 %1687 }
 0x17b   :  { %v1738_v31 = vpop.permute.xlu0 %1737  ;;  %v1768_v32 = vpop.permute.xlu1 %1767 }
 0x17f   :  { %v1570_v35 = vpop.permute.xlu1 %1569  ;;  %v1500_v36 = vpop.permute.xlu0 %1499 }
 0x180   :  { %v1508_v39 = vsel %vm1507_vm2, %v1498_v20, %v1500_v36  ;;  %v1578_v13 = vsel %vm1577_vm4, %v1568_v22, %v1570_v35 }
 0x181   :  { %v1517_v38 = vadd.f32 %v1508_v39, %v2302_v48 }
 0x183   :  { %v1640_v40 = vpop.permute.xlu1 %1639  ;;  %v1535_v23 = vpop.permute.xlu0 %1534  ;;  %1853 = vadd.xlane.f32.xlu1 %v1852_v37 }
 0x184   :  { %v1543_v0 = vsel %vm1542_vm3, %v1533_v19, %v1535_v23  ;;  %v1648_v44 = vsel %vm1647_vm6, %v1638_v25, %v1640_v40 }
 0x185   :  { %v1552_v1 = vadd.f32 %v1543_v0, %v1517_v38 }
 0x187   :  { %v1587_v15 = vadd.f32 %v1578_v13, %v1552_v1  ;;  %v1605_v29 = vpop.permute.xlu0 %1604  ;;  %v1690_v42 = vpop.permute.xlu1 %1689 }
 0x188   :  { %v1613_v41 = vsel %vm1612_vm5, %v1603_v21, %v1605_v29  ;;  %v1698_v14 = vsel %vm1697_vm8, %v1688_v27, %v1690_v42 }
 0x189   :  { %v1622_v43 = vadd.f32 %v1613_v41, %v1587_v15 }
 0x18b   :  { %v1657_v45 = vadd.f32 %v1648_v44, %v1622_v43  ;;  %v1665_v46 = vpop.permute.xlu0 %1664  ;;  %v1740_v48 = vpop.permute.xlu1 %1739 }
 0x18c   :  { %v1673_v47 = vsel %vm1672_vm7, %v1663_v24, %v1665_v46  ;;  %v1748_v53 = vsel %vm1747_vm10, %v1738_v31, %v1740_v48 }
 0x18d   :  { %v1682_v7 = vadd.f32 %v1673_v47, %v1657_v45 }
 0x18f   :  { %v1707_v49 = vadd.f32 %v1698_v14, %v1682_v7  ;;  %v1715_v50 = vpop.permute.xlu0 %1714 }
 0x190   :  { %v1723_v51 = vsel %vm1722_vm9, %v1713_v26, %v1715_v50 }
 0x191   :  { %v1732_v52 = vadd.f32 %v1723_v51, %v1707_v49 }
 0x193   :  { %v1757_v55 = vadd.f32 %v1748_v53, %v1732_v52  ;;  %v1770_v56 = vpop.permute.xlu0 %1769 }
 0x194   :  { %v1778_v57 = vsel %vm1777_vm11, %v1768_v32, %v1770_v56 }
 0x195   :  { %v2374_v58 = vadd.f32 %v1778_v57, %v1757_v55  ;;  %v1502_v59 = vpop.permute.xlu1 %1501 }
 0x196   :  { %v1509_v9 = vsel %vm1507_vm2, %v1500_v36, %v1502_v59 }
 0x197   :  { %v1506_v60 = vpop.permute.xlu0 %1505  ;;  %v1518_v12 = vadd.f32 %v1509_v9, %v2316_v54 }
 0x198   :  { %v1521_v34 = vadd.f32 %v1506_v60, %v2355_v18 }
 0x199   :  { %v1537_v61 = vpop.permute.xlu1 %1536 }
 0x19a   :  { %v1544_v11 = vsel %vm1542_vm3, %v1535_v23, %v1537_v61 }
 0x19b   :  { %v1572_v62 = vpop.permute.xlu0 %1571  ;;  %v1553_v19 = vadd.f32 %v1544_v11, %v1518_v12 }
 0x19c   :  { %v1579_v21 = vsel %vm1577_vm4, %v1570_v35, %v1572_v62 }
 0x19d   :  { %v1541_v63 = vpop.permute.xlu1 %1540  ;;  %v1588_v25 = vadd.f32 %v1579_v21, %v1553_v19 }
 0x19e   :  { %v1556_v37 = vadd.f32 %v1541_v63, %v1521_v34 }
 0x19f   :  { %v1576_v2 = vpop.permute.xlu0 %1575 }
 0x1a0   :  { %v1591_v1 = vadd.f32 %v1576_v2, %v1556_v37 }
 0x1a1   :  { %v1607_v3 = vpop.permute.xlu1 %1606 }
 0x1a2   :  { %v1614_v24 = vsel %vm1612_vm5, %v1605_v29, %v1607_v3 }
 0x1a3   :  { %v1642_v4 = vpop.permute.xlu0 %1641  ;;  %v1623_v27 = vadd.f32 %v1614_v24, %v1588_v25 }
 0x1a4   :  { %v1649_v30 = vsel %vm1647_vm6, %v1640_v40, %v1642_v4 }
 0x1a5   :  { %v1611_v5 = vpop.permute.xlu1 %1610  ;;  %v1658_v32 = vadd.f32 %v1649_v30, %v1623_v27 }
 0x1a6   :  { %v1626_v44 = vadd.f32 %v1611_v5, %v1591_v1 }
 0x1a7   :  { %v1646_v6 = vpop.permute.xlu0 %1645 }
 0x1a8   :  { %v1661_v55 = vadd.f32 %v1646_v6, %v1626_v44 }
 0x1a9   :  { %v1667_v10 = vpop.permute.xlu1 %1666 }
 0x1aa   :  { %v1674_v54 = vsel %vm1672_vm7, %v1665_v46, %v1667_v10 }
 0x1ab   :  { %v2379_v16 = vpop.permute.xlu0 %1691  ;;  %v1683_v35 = vadd.f32 %v1674_v54, %v1658_v32 }
 0x1ac   :  { %v1699_v39 = vsel %vm1697_vm8, %v1690_v42, %v2379_v16 }
 0x1ad   :  { %v1671_v20 = vpop.permute.xlu1 %1670  ;;  %v1708_v40 = vadd.f32 %v1699_v39, %v1683_v35 }
 0x1ae   :  { %v1686_v9 = vadd.f32 %v1671_v20, %v1661_v55 }
 0x1af   :  { %v2382_v22 = vpop.permute.xlu0 %1695 }
 0x1b0   :  { %v1711_v27 = vadd.f32 %v2382_v22, %v1686_v9 }
 0x1b1   :  { %v2385_v26 = vpop.permute.xlu1 %1716 }
 0x1b2   :  { %v1724_v23 = vsel %vm1722_vm9, %v1715_v50, %v2385_v26 }
 0x1b3   :  { %v2387_v28 = vpop.permute.xlu0 %1741  ;;  %v1733_v29 = vadd.f32 %v1724_v23, %v1708_v40 }
 0x1b4   :  { %v1749_v42 = vsel %vm1747_vm10, %v1740_v48, %v2387_v28 }
 0x1b5   :  { %v1721_v31 = vpop.permute.xlu1 %1720 }
 0x1b6   :  { %v1736_v34 = vadd.f32 %v1721_v31, %v1711_v27 }
 0x1b7   :  { %v2391_v33 = vpop.permute.xlu0 %1745 }
 0x1b8   :  { %v1761_v1 = vadd.f32 %v2391_v33, %v1736_v34 }
 0x1b9   :  { %v2394_v36 = vpop.permute.xlu1 %1771 }
 0x1ba   :  { %v1779_v49 = vsel %vm1777_vm11, %v1770_v56, %v2394_v36 }
 0x1bb   :  { %v1539_v38 = vpop.permute.xlu0 %1538 }
 0x1bc   :  { %v1545_v45 = vsel %vm1542_vm3, %v1537_v61, %v1539_v38  ;;  %v1546_v46 = vsel %vm1542_vm3, %v1539_v38, %v1541_v63 }
 0x1bd   :  { %v1504_v0 = vpop.permute.xlu1 %1503 }
 0x1be   :  { %v1510_v13 = vsel %vm1507_vm2, %v1502_v59, %v1504_v0  ;;  %v1511_v15 = vsel %vm1507_vm2, %v1504_v0, %v1506_v60 }
 0x1bf   :  { %v1519_v18 = vadd.f32 %v1510_v13, %v2338_v8  ;;  %v1520_v41 = vadd.f32 %v1511_v15, %v2350_v17  ;;  %v1609_v43 = vpop.permute.xlu0 %1608  ;;  %v1758_v17 = vadd.f32 %v1749_v42, %v1733_v29 }
 0x1c0   :  { %v1615_v48 = vsel %vm1612_vm5, %v1607_v3, %v1609_v43  ;;  %v1616_v57 = vsel %vm1612_vm5, %v1609_v43, %v1611_v5 }
 0x1c1   :  { %v1554_v47 = vadd.f32 %v1545_v45, %v1519_v18  ;;  %v1574_v7 = vpop.permute.xlu1 %1573  ;;  %v1555_v14 = vadd.f32 %v1546_v46, %v1520_v41  ;;  %v1788_v59 = vadd.f32 %v1779_v49, %v1758_v17 }
 0x1c2   :  { %v1580_v50 = vsel %vm1577_vm4, %v1572_v62, %v1574_v7  ;;  %v1581_v8 = vsel %vm1577_vm4, %v1574_v7, %v1576_v2 }
 0x1c3   :  { %v1589_v51 = vadd.f32 %v1580_v50, %v1554_v47  ;;  %v1590_v52 = vadd.f32 %v1581_v8, %v1555_v14  ;;  %v1669_v53 = vpop.permute.xlu0 %1668  ;;  %v1793_v24 = vadd.f32 0.5, %v1788_v59  ;;  %v1798_v18 = vmul.f32 %v1788_v59, %v2374_v58 }
 0x1c4   :  { %v1675_v19 = vsel %vm1672_vm7, %v1667_v10, %v1669_v53  ;;  %v1676_v21 = vsel %vm1672_vm7, %v1669_v53, %v1671_v20  ;;  %v1796_v44 = vmul.f32 %v1788_v59, %v1788_v59 }
 0x1c5   :  { %v1624_v60 = vadd.f32 %v1615_v48, %v1589_v51  ;;  %v1644_v61 = vpop.permute.xlu1 %1643  ;;  %v1625_v63 = vadd.f32 %v1616_v57, %v1590_v52  ;;  %v1810_v35 = vmul.f32 %v1793_v24, %v1793_v24 }
 0x1c6   :  { %v1650_v56 = vsel %vm1647_vm6, %v1642_v4, %v1644_v61  ;;  %v1651_v62 = vsel %vm1647_vm6, %v1644_v61, %v1646_v6  ;;  %v1792_v6 = vadd.f32 0.5, %v2374_v58 }
 0x1c7   :  { %v1659_v11 = vadd.f32 %v1650_v56, %v1624_v60  ;;  %v1660_v2 = vadd.f32 %v1651_v62, %v1625_v63  ;;  %v1719_v12 = vpop.permute.xlu0 %1718 }
 0x1c8   :  { %v1725_v10 = vsel %vm1722_vm9, %v2385_v26, %v1719_v12  ;;  %v1726_v20 = vsel %vm1722_vm9, %v1719_v12, %v1721_v31  ;;  %v1809_v40 = vmul.f32 %v1792_v6, %v1792_v6  ;;  %v1806_v50 = vmul.f32 2.0, %v1792_v6 }
 0x1c9   :  { %v1684_v3 = vadd.f32 %v1675_v19, %v1659_v11  ;;  %v1694_v25 = vpop.permute.xlu1 %1693  ;;  %v1685_v5 = vadd.f32 %v1676_v21, %v1660_v2 }
 0x1ca   :  { %v1700_v30 = vsel %vm1697_vm8, %v2379_v16, %v1694_v25  ;;  %v1701_v4 = vsel %vm1697_vm8, %v1694_v25, %v2382_v22  ;;  %v1811_v13 = vadd.f32 %v1810_v35, %v1809_v40  ;;  %v1807_v17 = vmul.f32 %v1806_v50, %v1793_v24 }
 0x1cb   :  { %v1709_v54 = vadd.f32 %v1700_v30, %v1684_v3  ;;  %v1710_v32 = vadd.f32 %v1701_v4, %v1685_v5  ;;  %v1774_v37 = vpop.permute.xlu0 %1773 }
 0x1cc   :  { %v1780_v26 = vsel %vm1777_vm11, %v2394_v36, %v1774_v37  ;;  %v1812_v46 = vadd.f32 0.0001, %v1811_v13  ;;  %v1816_v36 = vlaneseq }
 0x1cd   :  { %v1734_v39 = vadd.f32 %v1725_v10, %v1709_v54  ;;  %v1744_v38 = vpop.permute.xlu1 %1743  ;;  %v1735_v23 = vadd.f32 %v1726_v20, %v1710_v32 }
 0x1ce   :  { %v1750_v16 = vsel %vm1747_vm10, %v2387_v28, %v1744_v38  ;;  %v1751_v22 = vsel %vm1747_vm10, %v1744_v38, %v2391_v33  ;;  %v1794_v28 = vmul.f32 %v2374_v58, %v2374_v58  ;;  %2068 = vrcp.f32 %v1812_v46 }
 0x1cf   :  { %v1759_v0 = vadd.f32 %v1750_v16, %v1734_v39  ;;  %v1760_v31 = vadd.f32 %v1751_v22, %v1735_v23  ;;  %v1819_v49 = vand.u32 127, %v1816_v36  ;;  %v1817_v51 = vshrl.u32 %v1816_v36, 7 }
 0x1d0   :  { %v1808_v58 = vadd.f32 0.0001, %v1807_v17 }
 0x1d1   :  { %v1789_v15 = vadd.f32 %v1780_v26, %v1759_v0  ;;  %v1776_v29 = vpop.permute.xlu1 %1775  ;;  %v1825_v52 = vand.u32 15, %v1819_v49  ;;  %vm1820_vm12 = vcmp.lt.s32.totalorder %v1817_v51, 6 }
 0x1d2   :  { %v1781_v41 = vsel %vm1777_vm11, %v1774_v37, %v1776_v29  ;;  %v1791_v43 = vadd.f32 %v1776_v29, %v1761_v1 }
 0x1d3   :  { %v1790_v42 = vadd.f32 %v1781_v41, %v1760_v31  ;;  %v1795_v33 = vsub.f32 %v1789_v15, %v1794_v28  ;;  %vm1833_vm13 = vcmp.lt.s32.totalorder %v1825_v52, 6 }
 0x1d4   :  { %v1799_v45 = vsub.f32 %v1791_v43, %v1798_v18  ;;  %vm1834_vm14 = vmand %vm1820_vm12, %vm1833_vm13 }
 0x1d5   :  { %v1797_v47 = vsub.f32 %v1790_v42, %v1796_v44 }
 0x1d6   :  { %v1800_v8 = vmul.f32 2.0, %v1799_v45 }
 0x1d7   :  { %v1802_v7 = vadd.f32 %v1797_v47, %v1795_v33 }
 0x1d8   :  { %v2069_v53 = vpop.eup %2068  ;;  %v1801_v55 = vadd.f32 0.0009, %v1800_v8 }
 0x1d9   :  { %v1803_v14 = vadd.f32 0.0009, %v1802_v7  ;;  %v1814_v59 = vmul.f32 %v2069_v53, %v1808_v58 }
 0x1db   :  { %2070 = vrcp.f32 %v1803_v14 }
 0x1e5   :  { %v2071_v48 = vpop.eup %2070 }
 0x1e6   :  { %v1805_v57 = vmul.f32 %v2071_v48, %v1801_v55 }
 0x1e8   :  { %v1815_v60 = vmul.f32 %v1814_v59, %v1805_v57 }
 0x1ea   :  { %v1839_v61 = vsel %vm1834_vm14, %v1815_v60, 0.0 }
 0x1eb   :  { %v1840_v63 = vsel %vm1777_vm11, %v1839_v61, 0.0 }
 0x1ec   :  { %1841 = vadd.xlane.f32.xlu0 %v1840_v63 }
 0x210   :  { %v1854_v9 = vpop.xlane.xlu1 %1853 }
 0x211   :  { %v1855_v56 = vrot.slane %v1854_v9, 4 }
 0x213   :  { %v1856_v62 = vadd.f32 %v1855_v56, %v1854_v9 }
 0x215   :  { %v1857_v11 = vrot.slane %v1856_v62, 2 }
 0x217   :  { %v1858_v21 = vadd.f32 %v1857_v11, %v1856_v62 }
 0x219   :  { %v1859_v25 = vrot.slane %v1858_v21, 1 }
 0x21b   :  { %v1860_v30 = vadd.f32 %v1859_v25, %v1858_v21 }
 0x279   :  { %v1842_v2 = vpop.xlane.xlu0 %1841 }
 0x27a   :  { %v1843_v12 = vrot.slane %v1842_v2, 4 }
 0x27c   :  { %v1844_v19 = vadd.f32 %v1843_v12, %v1842_v2 }
 0x27e   :  { %v1845_v24 = vrot.slane %v1844_v19, 2 }
 0x280   :  { %v1846_v3 = vadd.f32 %v1845_v24, %v1844_v19 }
 0x282   :  { %v1847_v5 = vrot.slane %v1846_v3, 1 }
 0x284   :  { %v1848_v27 = vadd.f32 %v1847_v5, %v1846_v3 }
 0x286   :  { %2049 = vpush %v1848_v27 }
 0x287   :  { %2051 = vpush %v1860_v30 }
 0x2b7   :  { %s2050_s6 = spop %2049 }
 0x2b8   :  { %s2052_s7 = spop %2051  ;;  %1851 = sst [smem:[#allocation2]] %s2050_s6 }
 0x2b9   :  { %1863 = sst [smem:[#allocation4]] %s2052_s7 }
 0x2ba   :  { %2081 = shalt.err (!%p2078_p2)
}
 0x2bb   :  { %s2109_s15 = smov [#allocation2]   ;;  %s2082_s20 = scalar_lea.hbm %s2467_s4, 16 }
 0x2bc   :  { %1871 = dma.smem_to_hbm %s2109_s15, 16, %s2466_s3, [#allocation3]  }
 0x2bd   :  { %p2083_p3 = scmp.ne.s32.totalorder %s2467_s4, %s2082_s20  ;;  %p2086_p4 = scmp.lt.u32.totalorder %s2082_s20, %s2467_s4 }
 0x2bf   :  { %p2088_p5 = pnand %p2086_p4, %p2083_p3 }
 0x2c1   :  { %2091 = shalt.err (!%p2088_p5)
}
 0x2c2   :  { %s2110_s0 = smov [#allocation4]  }
 0x2c3   :  { %1879 = dma.smem_to_hbm %s2110_s0, 16, %s2467_s4, [#allocation5]  }
 0x2c4   :  { %2092 = dma.done.wait [#allocation3], 16  }
 0x2c5   :  { %2093 = vsyncadd [#allocation3], 4294967280 }
 0x2c6   :  { %2094 = dma.done.wait [#allocation5], 16  }
 0x2c7   :  { %2095 = vsyncadd [#allocation5], 4294967280 }
 0x2c8   :  { %1886 = sfence }
 0x2c9   :  { %1887 = vsyncpa [#allocation3], 1 }
 0x2ca   :  { %1888 = vsyncpa [#allocation5], 1 }

</bundles_post_ra>
